<compile_context>
chip_gen: v7x
topology: tpu7x:2x2x1
jax: 0.10.0
libtpu: 0.0.40
codegen_flags: <defaults>
</compile_context>

<pallas_src>
import functools

import jax
import jax.numpy as jnp
from jax.experimental import pallas as pl
from jax.experimental.pallas import tpu as pltpu


def _unfold_kernel(x_ref, o_ref, *, window_size, stride, dilation, pad_amt,
                   t_in, t_out, n_v):
    # x_ref: (cg, T, V)   o_ref: (cg, T_out, W*V)
    cg = x_ref.shape[0]
    dtype = x_ref.dtype
    cols = []
    for w in range(window_size):            # W is small & static -> unrolled
        base = w * dilation - pad_amt       # input row feeding output row t=0
        # Output rows whose source index base + t*stride falls in the leading
        # zero-pad region (< 0), the real input [0, T), or the trailing pad.
        head = 0 if base >= 0 else min(t_out, (-base + stride - 1) // stride)
        first_tail = max(head, min(t_out, (t_in - base + stride - 1) // stride))
        interior = first_tail - head
        tail = t_out - first_tail

        pieces = []
        if head:
            pieces.append(jnp.zeros((cg, head, n_v), dtype))
        if interior:
            start = base + head * stride    # >= 0 and in-bounds by construction
            if stride == 1:
                pieces.append(x_ref[:, start:start + interior, :])
            else:
                pieces.append(x_ref[:, pl.ds(start, interior, stride=stride), :])
        if tail:
            pieces.append(jnp.zeros((cg, tail, n_v), dtype))
        cols.append(pieces[0] if len(pieces) == 1
                    else jnp.concatenate(pieces, axis=1))

    # One wide store for the whole tile (instead of W masked lane-range stores).
    o_ref[...] = cols[0] if window_size == 1 else jnp.concatenate(cols, axis=-1)


def _round_up(a, b):
    return -(-a // b) * b


def _padded_tile_bytes(rows, cols, dtype):
    """VMEM footprint of a (rows, cols) tile after (8,128) sublane/lane padding."""
    itemsize = jnp.dtype(dtype).itemsize
    sublane = 8 * max(1, 4 // itemsize)      # 8 f32 / 16 bf16 / 32 int8
    return _round_up(max(rows, 1), sublane) * _round_up(max(cols, 1), 128) * itemsize


def _vmem_capacity_bytes():
    try:
        cap = getattr(pltpu.get_tpu_info(), "vmem_capacity_bytes", None)
        if cap:
            return int(cap)
    except Exception:
        pass
    return 64 << 20                          # conservative (v7x per-TC physical)


def unfold_temporal_windows(x, *, window_size, window_stride,
                            window_dilation=1, pad=True,
                            block_bytes_budget=None):
    """x: (N, C, T, V). Returns (N, C, T_out, window_size, V)."""
    N, C, T, V = x.shape
    W, s, d = window_size, window_stride, window_dilation
    p = (W + (W - 1) * (d - 1) - 1) // 2 if pad else 0
    t_out = (T + 2 * p - d * (W - 1) - 1) // s + 1
    assert t_out >= 1, "window does not fit in the (padded) temporal axis"

    NC = N * C
    x_flat = x.reshape(NC, T, V)             # free row-major view of NCHW

    # --- per-channel VMEM footprint on the real padded (8,128) tile layout ----
    in_b = _padded_tile_bytes(T, V, x.dtype)
    out_b = _padded_tile_bytes(t_out, W * V, x.dtype)
    col_b = _padded_tile_bytes(t_out, V, x.dtype)
    # double-buffered in/out blocks + assembled output value + W window columns
    per_chan = 2 * in_b + 2 * out_b + out_b + W * col_b

    vmem_cap = _vmem_capacity_bytes()
    if block_bytes_budget is None:
        block_bytes_budget = max(8 << 20, min(32 << 20, vmem_cap // 3))

    # --- choose how many (n, c) channel slabs each grid step handles ----------
    min_steps = 1 if NC == 1 else 2          # >= 2: keeps both v7x TCs busy
    cg = max(1, min(block_bytes_budget // per_chan, pl.cdiv(NC, min_steps)))
    cg = min(cg, NC)
    for cand in range(cg, 0, -1):            # prefer a divisor (no ragged block)
        if NC % cand == 0:
            if 2 * cand >= cg:               # only if it stays near budget size
                cg = cand
            break
    grid = (pl.cdiv(NC, cg),)

    vmem_needed = cg * per_chan
    vmem_limit = min(int(vmem_cap * 0.9),
                     max(32 << 20, vmem_needed * 5 // 4 + (2 << 20)))

    kernel = functools.partial(
        _unfold_kernel, window_size=W, stride=s, dilation=d, pad_amt=p,
        t_in=T, t_out=t_out, n_v=V)

    itemsize = jnp.dtype(x.dtype).itemsize
    bytes_accessed = NC * (T * V + t_out * W * V) * itemsize

    out_flat = pl.pallas_call(
        kernel,
        out_shape=jax.ShapeDtypeStruct((NC, t_out, W * V), x.dtype),
        grid_spec=pltpu.PrefetchScalarGridSpec(
            num_scalar_prefetch=0,
            grid=grid,
            in_specs=[pl.BlockSpec((cg, T, V), lambda i: (i, 0, 0))],
            out_specs=pl.BlockSpec((cg, t_out, W * V), lambda i: (i, 0, 0))),
        compiler_params=pltpu.CompilerParams(
            dimension_semantics=("parallel",),
            vmem_limit_bytes=vmem_limit),
        cost_estimate=pl.CostEstimate(
            flops=0, transcendentals=0, bytes_accessed=bytes_accessed),
    )(x_flat)

    # Free reshape: (NC, T_out, W*V) is the row-major layout of (N,C,T_out,W,V).
    return out_flat.reshape(N, C, t_out, W, V)


def reference(x, *, window_size, window_stride, window_dilation=1, pad=True):
    """Pure-JAX reference of the PyTorch UnfoldTemporalWindows forward."""
    N, C, T, V = x.shape
    W, s, d = window_size, window_stride, window_dilation
    p = (W + (W - 1) * (d - 1) - 1) // 2 if pad else 0
    x_pad = jnp.pad(x, ((0, 0), (0, 0), (p, p), (0, 0)))
    t_out = (T + 2 * p - d * (W - 1) - 1) // s + 1
    idx = jnp.arange(t_out)[:, None] * s + jnp.arange(W)[None, :] * d  # (t_out, W)
    return x_pad[:, :, idx, :]                                          # (N,C,t_out,W,V)


if __name__ == "__main__":
    key = jax.random.PRNGKey(0)
    N, C, T, V = 2, 4, 16, 16
    x = jax.random.normal(key, (N, C, T, V), dtype=jnp.float32)

    configs = [
        dict(window_size=3, window_stride=1, window_dilation=1, pad=True),
        dict(window_size=5, window_stride=1, window_dilation=2, pad=True),
        dict(window_size=3, window_stride=2, window_dilation=1, pad=True),
        dict(window_size=3, window_stride=1, window_dilation=1, pad=False),
    ]
    for cfg in configs:
        out = jax.block_until_ready(unfold_temporal_windows(x, **cfg))
        ref = reference(x, **cfg)
        assert out.shape == ref.shape, (cfg, out.shape, ref.shape)
        assert bool(jnp.array_equal(out, ref)), \
            (cfg, float(jnp.max(jnp.abs(out - ref))))

    print("KERNEL_OK")
</pallas_src>

<mosaic_0001>
module attributes {stable_mosaic.version = 11 : i64} {
  func.func @_unfold_kernel(%arg0: i32, %arg1: memref<4x16x16xf32, #tpu.memory_space<vmem>>, %arg2: memref<4x16x48xf32, #tpu.memory_space<vmem>>) attributes {dimension_semantics = [#tpu.dimension_semantics<parallel>], iteration_bounds = array<i64: 2>, scalar_prefetch = 0 : i64, scratch_operands = 0 : i64, tpu.core_type = #tpu.core_type<tc>, window_params = [{transform_indices = @transform_0, window_bounds = array<i64: 4, 16, 16>}, {transform_indices = @transform_1, window_bounds = array<i64: 4, 16, 48>}]} {
    %cst = arith.constant 0.000000e+00 : f32
    %0 = vector.broadcast %cst : f32 to vector<4x1x16xf32>
    %c0 = arith.constant 0 : index
    %c0_0 = arith.constant 0 : index
    %c0_1 = arith.constant 0 : index
    %1 = vector.load %arg1[%c0, %c0_0, %c0_1] : memref<4x16x16xf32, #tpu.memory_space<vmem>>, vector<4x15x16xf32>
    %2 = tpu.concatenate %0, %1 in 1 : vector<4x1x16xf32>, vector<4x15x16xf32> -> vector<4x16x16xf32>
    %c0_2 = arith.constant 0 : index
    %c0_3 = arith.constant 0 : index
    %c0_4 = arith.constant 0 : index
    %3 = vector.load %arg1[%c0_2, %c0_3, %c0_4] : memref<4x16x16xf32, #tpu.memory_space<vmem>>, vector<4x16x16xf32>
    %c0_5 = arith.constant 0 : index
    %c1 = arith.constant 1 : index
    %c0_6 = arith.constant 0 : index
    %4 = vector.load %arg1[%c0_5, %c1, %c0_6] : memref<4x16x16xf32, #tpu.memory_space<vmem>>, vector<4x15x16xf32>
    %cst_7 = arith.constant 0.000000e+00 : f32
    %5 = vector.broadcast %cst_7 : f32 to vector<4x1x16xf32>
    %6 = tpu.concatenate %4, %5 in 1 : vector<4x15x16xf32>, vector<4x1x16xf32> -> vector<4x16x16xf32>
    %7 = tpu.concatenate %2, %3, %6 in 2 : vector<4x16x16xf32>, vector<4x16x16xf32>, vector<4x16x16xf32> -> vector<4x16x48xf32>
    %c0_8 = arith.constant 0 : index
    %c0_9 = arith.constant 0 : index
    %c0_10 = arith.constant 0 : index
    %8 = vector.load %arg2[%c0_8, %c0_9, %c0_10] : memref<4x16x48xf32, #tpu.memory_space<vmem>>, vector<4x16x48xf32>
    tpu.vector_store %arg2[%c0_8, %c0_9, %c0_10], %7 {strides = array<i32>} : memref<4x16x48xf32, #tpu.memory_space<vmem>>, vector<4x16x48xf32>,
    return
  }
  func.func @transform_0(%arg0: i32) -> (i32, i32, i32) {
    %c0_i32 = arith.constant 0 : i32
    %c0_i32_0 = arith.constant 0 : i32
    %c0_i32_1 = arith.constant 0 : i32
    return %arg0, %c0_i32, %c0_i32_0 : i32, i32, i32
  }
  func.func @transform_1(%arg0: i32) -> (i32, i32, i32) {
    %c0_i32 = arith.constant 0 : i32
    %c0_i32_0 = arith.constant 0 : i32
    %c0_i32_1 = arith.constant 0 : i32
    return %arg0, %c0_i32, %c0_i32_0 : i32, i32, i32
  }
}

</mosaic_0001>

<bundles_post_ra>
// kernel: tpu_custom_call.1
= control target key start
LH: loop header
LB: loop body
LE: loop exit
PB: predicated region body
PF: predicated region fallthrough
CT: control target
= control target key end

     0   :  { %6 = vsyncpa [#allocation3], 0  ;;  %s806_s0 = inlined_call_operand.hbm [shape: f32[8,16,16], index: 0, kind: input, shape index: {}]   ;;  %s807_s1 = inlined_call_operand.hbm [shape: f32[8,16,48], index: 1, kind: output, shape index: {}]  }
   0x1   :  { %8 = vsyncpa [#allocation3 + $0x1], 0 }
   0x2   :  { %9 = vsyncpa [#allocation4], 0 }
   0x3   :  { %11 = vsyncpa [#allocation4 + $0x1], 0  ;;  %s559_s6 = smov 0   ;;  %s561_s7 = smov 0  }
   0x4   :  { %s563_s8 = smov 0   ;;  %s565_s9 = smov 0  }
   0x5 LB: > { %s580_s10 = sadd.s32 4294967295, %s539_s9   ;;  %s371_s11 = sadd.s32 4294967294, %s539_s9   ;;  %s539_s9 = sphi %s565_s9, %s820_s9   ;;  %s535_s8 = sphi %s563_s8, %s819_s8   ;;  %s531_s7 = sphi %s561_s7, %s818_s7   ;;  %s527_s6 = sphi %s559_s6, %s817_s6  }
   0x6   : > { %s584_s12 = sadd.s32 1, %s539_s9   ;;  %s24_s13 = sadd.s32 1, %s535_s8 }
   0x7   : > { %s21_s14 = ssub.s32 %s539_s9, %s584_s12  ;;  %p31_p0 = scmp.ne.s32.totalorder %s535_s8, %s531_s7 }
   0x8   : > { %p22_p1 = scmp.eq.s32.totalorder %s21_s14, 0  ;;  %p32_p2 = scmp.eq.s32.totalorder %s539_s9, 0 }
   0x9   : > { %p37_p3 = scmp.ne.s32.totalorder %s531_s7, %s527_s6  ;;  %p38_p4 = scmp.eq.s32.totalorder %s580_s10, 0 }
   0xa   : > { %s596_s15 = scalar_select %p22_p1, %s535_s8, %s24_s13  }
   0xb   : > { %p598_p5 = por %p32_p2, %p31_p0  ;;  %p602_p6 = por %p38_p4, %p37_p3 }
   0xc   : > { %p61_p7 = scmp.eq.s32.totalorder %s580_s10, 1  ;;  %p67_p8 = scmp.eq.s32.totalorder %s371_s11, 1 }
   0xd   : > { %p403_p10 = scmp.lt.s32.totalorder %s539_s9, 2  ;;  %s87_s20 = sand.u32 1, %s535_s8  }
   0xe   : > { %p609_p11 = por %p61_p7, %p31_p0  ;;  %p613_p12 = por %p67_p8, %p37_p3 }
   0xf   : > { %s388_s21 = sshll.u32 %s539_s9, 10  ;;  %s374_s22 = sshll.u32 %s87_s20, 6 }
  0x10   : > { %s811_s18 = scalar_select %p609_p11, 1, 0 }
  0x11   : > { %s812_s19 = scalar_select %p613_p12, 1, 0 }
  0x12   : > { %s622_s25 = scalar_lea.hbm %s806_s0, %s388_s21  ;;  %s91_s26 = scalar_lea.vmem [#allocation2], %s374_s22 }
  0x13   : > { %s99_s27 = sshll.u32 %s91_s26, 4  ;;  %p626_p13 = pnand %p403_p10, %p598_p5  ;;  %s630_s27 = int_to_ptr.vmem [resolvable:$true] %s99_s27 }
  0x14   : > { %s632_s29 = scalar_lea.sflag [#allocation3], %s87_s20  ;;  %s443_s30 = scalar_lea.hbm %s622_s25, 1024 }
  0x15   : > { %p444_p0 = scmp.ne.s32.totalorder %s622_s25, %s443_s30  ;;  %p445_p1 = pneg %p626_p13 }
  0x16   : > { %s448_s4 = scalar_lea.hbm %s806_s0, 2048  ;;  %p449_p4 = scmp.lt.u32.totalorder %s622_s25, %s806_s0 }
  0x17   : > { %p446_p2 = pnand %p445_p1, %p444_p0  ;;  %p450_p5 = scmp.lt.u32.totalorder %s448_s4, %s443_s30 }
  0x18   : > { %p452_p8 = scmp.lt.u32.totalorder %s443_s30, %s622_s25 }
  0x19   : > { %p447_p3 = pneg %p446_p2  ;;  %p451_p7 = por %p450_p5, %p449_p4 }
  0x1b   : > { %p453_p10 = por %p452_p8, %p451_p7 }
  0x1d   : > { %p454_p9 = pnand %p453_p10, %p447_p3 }
  0x1f   : > { %457 = shalt.err (!%p454_p9)
}
  0x20   : > { %s458_s13 = scalar_lea.vmem %s630_s27, 1024  ;;  %s541_s14 = smov [#allocation2]  }
  0x21   : > { %p459_p0 = scmp.ne.s32.totalorder %s630_s27, %s458_s13  ;;  %s463_s16 = sshll.u32 %s541_s14, 4  ;;  %s464_s16 = int_to_ptr.vmem [resolvable:$false] %s463_s16 }
  0x22   : > { %s465_s20 = scalar_lea.vmem %s464_s16, 2048  ;;  %p466_p11 = scmp.lt.s32.totalorder %s630_s27, %s464_s16 }
  0x23   : > { %p461_p2 = pnand %p459_p0, %p445_p1  ;;  %p467_p4 = scmp.lt.s32.totalorder %s465_s20, %s458_s13 }
  0x25   : > { %p462_p12 = pneg %p461_p2  ;;  %p468_p5 = por %p467_p4, %p466_p11 }
  0x27   : > { %p469_p7 = pnand %p468_p5, %p462_p12 }
  0x29   : > { %472 = shalt.err (!%p469_p7)
}
  0x2a   : > { %s542_s21 = smov 128   ;;  %s543_s22 = smov 8  }
  0x2b   : > { %398 = dma.hbm_to_vmem [thread:$0]  (!%p626_p13), %s622_s25, 1024, %s630_s27, %s632_s29, %s542_s21, %s542_s21, %s543_s22  }
  0x2c   : > { %p378_p9 = scmp.ge.s32.totalorder %s539_s9, 1  ;;  %p107_p1 = scmp.lt.s32.totalorder %s539_s9, 3 }
  0x2e   : > { %p108_p3 = pnand %p378_p9, %p107_p1 }
  0x2f   : > { %s663_s23 = sand.u32 (!%p108_p3), 1, %s531_s7  }
  0x30   : > { %111 = sbr.rel (%p108_p3) target bundleno = 216 (0xd8), region = 24  ;;  %s379_s24 = sshll.u32 (!%p108_p3), %s663_s23, 6 }
  0x31   : > { %s114_s26 = scalar_lea.sflag (!%p108_p3), [#allocation3], %s663_s23  ;;  %s669_s30 = scalar_lea.vmem (!%p108_p3), [#allocation2], %s379_s24 }
  0x37   : > { %518 = dma.done.wait (%p602_p6), %s114_s26, 1024  }
  0x38   : > { %520 = vsyncadd (%p602_p6), %s114_s26, 4294966272  ;;  %v676_v0 = vld [vmem:[%s669_s30 + $0x10] sm:$0xff]  ;;  %v138_v1 = vld [vmem:[%s669_s30] sm:$0xff]  ;;  %s544_s25 = smov 16   ;;  %vm191_vm0 = vcmask 1046528   ;;  %s545_s17 = smov 32  }
  0x39   : > { %204 = vrot.lane.b32.xlu1 %v676_v0, %s544_s25  ;;  %200 = vrot.lane.b32.xlu0 %v138_v1, %s544_s25  ;;  %v180_v2 = vld [vmem:[%s669_s30 + $0x18] sm:$0xff]  ;;  %v179_v3 = vld [vmem:[%s669_s30 + $0x8] sm:$0xff]  ;;  %v155_v27 = vrot.slane %v138_v1, 7  ;;  %vm154_vm1 = vcmask 1040384   ;;  %v158_v30 = vrot.slane %v676_v0, 7  ;;  %vm256_vm2 = vcmask 130048  }
  0x3a   : > { %v181_v4 = vld [vmem:[%s669_s30 + $0x28] sm:$0xff]  ;;  %v684_v5 = vld [vmem:[%s669_s30 + $0x20] sm:$0xff]  ;;  %v182_v6 = vld [vmem:[%s669_s30 + $0x38] sm:$0xff]  ;;  %vm265_vm3 = vcmask 261120   ;;  %vm274_vm4 = vcmask 392192   ;;  %s720_s27 = scalar_lea.vmem [#allocation5], %s379_s24 }
  0x3b   : > { %v689_v7 = vld [vmem:[%s669_s30 + $0x30] sm:$0xff]  ;;  %v184_v8 = vld [vmem:[%s669_s30 + $0x9] sm:$0x7f]  ;;  %v183_v10 = vld [vmem:[%s669_s30 + $0x1] sm:$0xff]  ;;  %v175_v33 = vsel %vm154_vm1, 0.0, %v155_v27  ;;  %v176_v37 = vsel %vm154_vm1, 0.0, %v158_v30 }
  0x3c   : > { %v192_v9 = vsel %vm191_vm0, %v184_v8, 0.0  ;;  %v186_v11 = vld [vmem:[%s669_s30 + $0x19] sm:$0x7f]  ;;  %v185_v13 = vld [vmem:[%s669_s30 + $0x11] sm:$0xff]  ;;  %v188_v14 = vld [vmem:[%s669_s30 + $0x29] sm:$0x7f] }
  0x3d   : > { %206 = vrot.lane.b32.xlu1 %v180_v2, %s544_s25  ;;  %202 = vrot.lane.b32.xlu0 %v179_v3, %s544_s25  ;;  %v193_v12 = vsel %vm191_vm0, %v186_v11, 0.0  ;;  %v194_v15 = vsel %vm191_vm0, %v188_v14, 0.0  ;;  %v187_v16 = vld [vmem:[%s669_s30 + $0x21] sm:$0xff]  ;;  %v190_v17 = vld [vmem:[%s669_s30 + $0x39] sm:$0x7f]  ;;  %v161_v38 = vrot.slane %v684_v5, 7 }
  0x3e   : > { %v195_v18 = vsel %vm191_vm0, %v190_v17, 0.0  ;;  %v189_v19 = vld [vmem:[%s669_s30 + $0x31] sm:$0xff]  ;;  %v139_v24 = vld [vmem:[%s669_s30 + $0x8] sm:$0x7f]  ;;  %v164_v48 = vrot.slane %v689_v7, 7  ;;  %s298_s28 = sshll.u32 %s720_s27, 4  ;;  %s745_s28 = int_to_ptr.vmem [resolvable:$true] %s298_s28 }
  0x3f   : > { %v156_v28 = vrot.slane %v139_v24, 7  ;;  %v141_v29 = vld [vmem:[%s669_s30 + $0x18] sm:$0x7f]  ;;  %v143_v36 = vld [vmem:[%s669_s30 + $0x28] sm:$0x7f]  ;;  %v177_v51 = vsel %vm154_vm1, 0.0, %v161_v38 }
  0x40   : > { %v159_v34 = vrot.slane %v141_v29, 7  ;;  %v162_v44 = vrot.slane %v143_v36, 7  ;;  %v145_v47 = vld [vmem:[%s669_s30 + $0x38] sm:$0x7f]  ;;  %s390_s29 = sshll.u32 %s580_s10, 10  ;;  %v178_v63 = vsel %vm154_vm1, 0.0, %v164_v48 }
  0x41   : > { %210 = vrot.lane.b32.xlu1 %v181_v4, %s544_s25  ;;  %208 = vrot.lane.b32.xlu0 %v684_v5, %s544_s25  ;;  %v157_v35 = vsel %vm154_vm1, %v155_v27, %v156_v28  ;;  %v165_v55 = vrot.slane %v145_v47, 7  ;;  %s754_s3 = scalar_lea.hbm %s807_s1, %s390_s29  ;;  %s284_s4 = scalar_lea.sflag [#allocation4], %s663_s23 }
  0x42   : > { %v160_v43 = vsel %vm154_vm1, %v158_v30, %v159_v34  ;;  %v163_v54 = vsel %vm154_vm1, %v161_v38, %v162_v44  ;;  %s473_s5 = scalar_lea.vmem %s745_s28, 1024  ;;  %p814_p11 = scmp.ne.s32.totalorder %s811_s18, 0 }
  0x43   : > { %v166_v62 = vsel %vm154_vm1, %v164_v48, %v165_v55  ;;  %p474_p6 = scmp.ne.s32.totalorder %s745_s28, %s473_s5  ;;  %s546_s11 = smov [#allocation5]  }
  0x44   : > { %s477_s13 = sshll.u32 %s546_s11, 4  ;;  %s478_s13 = int_to_ptr.vmem [resolvable:$false] %s477_s13 }
  0x45   : > { %214 = vrot.lane.b32.xlu1 %v182_v6, %s544_s25  ;;  %212 = vrot.lane.b32.xlu0 %v689_v7, %s544_s25  ;;  %p475_p12 = pnand %p474_p6, %p814_p11  ;;  %s479_s14 = scalar_lea.vmem %s478_s13, 2048 }
  0x46   : > { %p480_p8 = scmp.lt.s32.totalorder %s745_s28, %s478_s13  ;;  %p481_p10 = scmp.lt.s32.totalorder %s479_s14, %s473_s5 }
  0x47   : > { %p476_p13 = pneg %p475_p12 }
  0x48   : > { %p482_p0 = por %p481_p10, %p480_p8 }
  0x49   : > { %234 = vrot.lane.b32.xlu1 %v192_v9, %s545_s17  ;;  %232 = vrot.lane.b32.xlu0 %v183_v10, %s545_s17 }
  0x4a   : > { %p483_p2 = pnand %p482_p0, %p476_p13 }
  0x4d   : > { %238 = vrot.lane.b32.xlu1 %v193_v12, %s545_s17  ;;  %236 = vrot.lane.b32.xlu0 %v185_v13, %s545_s17 }
  0x51   : > { %242 = vrot.lane.b32.xlu1 %v194_v15, %s545_s17  ;;  %240 = vrot.lane.b32.xlu0 %v187_v16, %s545_s17 }
  0x55   : > { %246 = vrot.lane.b32.xlu1 %v195_v18, %s545_s17  ;;  %244 = vrot.lane.b32.xlu0 %v189_v19, %s545_s17 }
  0xab   : > { %v205_v20 = vpop.permute.xlu1 %204  ;;  %v201_v21 = vpop.permute.xlu0 %200 }
  0xac   : > { %v257_v39 = vsel %vm256_vm2, %v175_v33, %v201_v21  ;;  %v259_v49 = vsel %vm256_vm2, %v176_v37, %v205_v20 }
  0xaf   : > { %v207_v22 = vpop.permute.xlu1 %206  ;;  %v203_v23 = vpop.permute.xlu0 %202 }
  0xb0   : > { %v258_v40 = vsel %vm256_vm2, %v157_v35, %v203_v23  ;;  %v260_v50 = vsel %vm256_vm2, %v160_v43, %v207_v22 }
  0xb3   : > { %v211_v25 = vpop.permute.xlu1 %210  ;;  %v209_v26 = vpop.permute.xlu0 %208 }
  0xb4   : > { %v262_v58 = vsel %vm256_vm2, %v163_v54, %v211_v25  ;;  %v261_v59 = vsel %vm256_vm2, %v177_v51, %v209_v26 }
  0xb7   : > { %v215_v31 = vpop.permute.xlu1 %214  ;;  %v213_v32 = vpop.permute.xlu0 %212 }
  0xb8   : > { %v264_v2 = vsel %vm256_vm2, %v166_v62, %v215_v31  ;;  %v263_v3 = vsel %vm256_vm2, %v178_v63, %v213_v32 }
  0xbb   : > { %v235_v41 = vpop.permute.xlu1 %234  ;;  %v233_v42 = vpop.permute.xlu0 %232 }
  0xbc   : > { %v267_v45 = vsel %vm265_vm3, %v258_v40, %v235_v41  ;;  %v266_v46 = vsel %vm265_vm3, %v257_v39, %v233_v42 }
  0xbd   : > { %276 = vst.msk [vmem:[%s720_s27 + $0x8] sm:$0xff] %vm274_vm4, %v267_v45  ;;  %275 = vst.msk [vmem:[%s720_s27] sm:$0xff] %vm274_vm4, %v266_v46 }
  0xbf   : > { %v239_v52 = vpop.permute.xlu1 %238  ;;  %v237_v53 = vpop.permute.xlu0 %236 }
  0xc0   : > { %v269_v56 = vsel %vm265_vm3, %v260_v50, %v239_v52  ;;  %v268_v57 = vsel %vm265_vm3, %v259_v49, %v237_v53 }
  0xc1   : > { %278 = vst.msk [vmem:[%s720_s27 + $0x18] sm:$0xff] %vm274_vm4, %v269_v56  ;;  %277 = vst.msk [vmem:[%s720_s27 + $0x10] sm:$0xff] %vm274_vm4, %v268_v57 }
  0xc3   : > { %v243_v60 = vpop.permute.xlu1 %242  ;;  %v241_v61 = vpop.permute.xlu0 %240 }
  0xc4   : > { %v271_v0 = vsel %vm265_vm3, %v262_v58, %v243_v60  ;;  %v270_v1 = vsel %vm265_vm3, %v261_v59, %v241_v61 }
  0xc5   : > { %280 = vst.msk [vmem:[%s720_s27 + $0x28] sm:$0xff] %vm274_vm4, %v271_v0  ;;  %279 = vst.msk [vmem:[%s720_s27 + $0x20] sm:$0xff] %vm274_vm4, %v270_v1 }
  0xc7   : > { %v247_v4 = vpop.permute.xlu1 %246  ;;  %v245_v5 = vpop.permute.xlu0 %244 }
  0xc8   : > { %v273_v6 = vsel %vm265_vm3, %v264_v2, %v247_v4  ;;  %v272_v7 = vsel %vm265_vm3, %v263_v3, %v245_v5 }
  0xc9   : > { %282 = vst.msk [vmem:[%s720_s27 + $0x38] sm:$0xff] %vm274_vm4, %v273_v6  ;;  %281 = vst.msk [vmem:[%s720_s27 + $0x30] sm:$0xff] %vm274_vm4, %v272_v7 }
  0xca   : > { %486 = shalt.err (!%p483_p2)
}
  0xcb   : > { %s487_s16 = scalar_lea.hbm %s754_s3, 1024  ;;  %s491_s22 = scalar_lea.hbm %s807_s1, 2048 }
  0xcc   : > { %p488_p4 = scmp.ne.s32.totalorder %s754_s3, %s487_s16  ;;  %p492_p9 = scmp.lt.u32.totalorder %s754_s3, %s807_s1 }
  0xcd   : > { %p493_p1 = scmp.lt.u32.totalorder %s491_s22, %s487_s16  ;;  %p495_p6 = scmp.lt.u32.totalorder %s487_s16, %s754_s3 }
  0xce   : > { %p489_p5 = pnand %p488_p4, %p814_p11 }
  0xcf   : > { %p494_p3 = por %p493_p1, %p492_p9 }
  0xd0   : > { %p490_p7 = pneg %p489_p5 }
  0xd1   : > { %p496_p12 = por %p495_p6, %p494_p3 }
  0xd3   : > { %p497_p13 = pnand %p496_p12, %p490_p7 }
  0xd5   : > { %500 = shalt.err (!%p497_p13)
}
  0xd6   : > { %s547_s30 = smov 128   ;;  %s548_s25 = smov 8  }
  0xd7   : > { %393 = dma.vmem_to_hbm [thread:$0]  (%p814_p11), %s745_s28, 1024, %s754_s3, %s284_s4, %s547_s30, %s547_s30, %s548_s25  }
  0xd8 PF: > { %s313_s17 = sand.u32 1, %s527_s6   ;;  %p815_p8 = scmp.ne.s32.totalorder %s812_s19, 0 }
  0xd9   : > { %p816_p10 = scmp.ge.s32.totalorder %s539_s9, 2  ;;  %s314_s27 = scalar_lea.sflag [#allocation4], %s313_s17 }
  0xdb   : > { %p400_p0 = pnand %p816_p10, %p815_p8 }
  0xdd   : > { %522 = dma.done.wait (!%p400_p0), %s314_s27, 1024  }
  0xde   : > { %524 = vsyncadd (!%p400_p0), %s314_s27, 4294966272  ;;  %p14_p2 = scmp.ge.s32.totalorder %s584_s12, 4   ;;  %s817_s6 = smov %s531_s7 }
  0xdf   : > { %s818_s7 = smov %s535_s8  ;;  %s819_s8 = smov %s596_s15 }
  0xe0   : > { %s820_s9 = smov %s584_s12  ;;  %16 = sbr.rel (!%p14_p2) target bundleno = 5 (0x5), region = 69 }
  0xe7   :  { %319 = vsyncpa [#allocation3], 1 }
  0xe8   :  { %321 = vsyncpa [#allocation3 + $0x1], 1 }
  0xe9   :  { %322 = vsyncpa [#allocation4], 1 }
  0xea   :  { %324 = vsyncpa [#allocation4 + $0x1], 1 }

</bundles_post_ra>
